<compile_context>
chip_gen: v7x
topology: tpu7x:2x2x1
jax: 0.10.0
libtpu: 0.0.40
codegen_flags: <defaults>
</compile_context>

<pallas_src>
import jax
import jax.numpy as jnp
from jax import lax
from jax.experimental import pallas as pl
from jax.experimental.pallas import tpu as pltpu

_DEFAULT_CHUNK_BYTES = 8 * 1024 * 1024  # ~8 MiB per in-flight DMA chunk


def _resolve_shape(total, shape):
    """torch.view-style shape resolution (one -1 allowed)."""
    shape = list(shape)
    neg = [i for i, s in enumerate(shape) if s == -1]
    if len(neg) > 1:
        raise ValueError("only one -1 allowed in view shape")
    if neg:
        known = 1
        for i, s in enumerate(shape):
            if i != neg[0]:
                known *= s
        shape[neg[0]] = total // known
    prod = 1
    for s in shape:
        prod *= s
    assert prod == total, (shape, total)
    return tuple(shape)


def _make_dma_copy_kernel(chunk, n_full, tail):
    """HBM->HBM copy: `n_full` chunks of `chunk` leading rows + `tail` rows."""

    def kernel(x_hbm, o_hbm, sem):
        def dma(start, size, slot):
            return pltpu.make_async_copy(
                x_hbm.at[pl.ds(start, size)],
                o_hbm.at[pl.ds(start, size)],
                sem.at[slot],
            )

        # Prime up to two full chunks so two DMAs are in flight.
        if n_full >= 1:
            dma(0, chunk, 0).start()
        if n_full >= 2:
            dma(chunk, chunk, 1).start()

        if n_full >= 1:
            def body(c, carry):
                slot = c % 2
                # Wait for chunk c, then reuse its semaphore slot for chunk c+2.
                dma(c * chunk, chunk, slot).wait()

                @pl.when(c + 2 < n_full)
                def _():
                    dma((c + 2) * chunk, chunk, slot).start()

                return carry

            lax.fori_loop(0, n_full, body, 0)

        if tail > 0:
            cp = dma(n_full * chunk, tail, 0)
            cp.start()
            cp.wait()

    return kernel


def _pallas_materialize_copy(x, *, chunk_bytes=_DEFAULT_CHUNK_BYTES):
    """Materialize an independent copy of `x` via a direct HBM->HBM DMA kernel."""
    if x.ndim == 0:
        out = _pallas_materialize_copy(x.reshape(1), chunk_bytes=chunk_bytes)
        return out.reshape(())

    lead = x.shape[0]
    itemsize = jnp.dtype(x.dtype).itemsize
    row_bytes = itemsize
    for d in x.shape[1:]:
        row_bytes *= d

    chunk = max(1, min(lead, chunk_bytes // max(row_bytes, 1)))
    if chunk < lead and chunk >= 8:
        chunk -= chunk % 8  # keep full-chunk slices sublane-tile aligned
    n_full = lead // chunk
    tail = lead - n_full * chunk

    total_bytes = lead * row_bytes
    return pl.pallas_call(
        _make_dma_copy_kernel(chunk, n_full, tail),
        out_shape=jax.ShapeDtypeStruct(x.shape, x.dtype),
        in_specs=[pl.BlockSpec(memory_space=pl.ANY)],
        out_specs=pl.BlockSpec(memory_space=pl.ANY),
        scratch_shapes=[pltpu.SemaphoreType.DMA((2,))],
        cost_estimate=pl.CostEstimate(
            flops=0, transcendentals=0, bytes_accessed=2 * total_bytes),
    )(x)


def view(x, shape, *, copy=False, chunk_bytes=_DEFAULT_CHUNK_BYTES):
    """Pallas/JAX equivalent of torch `View(*shape)` forward: x.view(shape).

    copy=False -> metadata-only reshape (what a torch view actually is; zero cost).
    copy=True  -> materialize an independent buffer through the Pallas DMA kernel.
    """
    total = x.size
    target = _resolve_shape(total, shape)
    if not copy:
        return x.reshape(target)  # zero-cost fast path: no kernel, no HBM traffic
    return _pallas_materialize_copy(x, chunk_bytes=chunk_bytes).reshape(target)


if __name__ == "__main__":
    key = jax.random.PRNGKey(0)
    k1, k2 = jax.random.split(key)

    # 1) Typical View(B, -1) usage from hand_poser.py — whole-array single-DMA path.
    x = jax.random.normal(k1, (2, 4, 16, 16), dtype=jnp.float32)
    out = jax.block_until_ready(view(x, (2, -1), copy=True))
    ref = x.reshape(2, -1)
    assert out.shape == ref.shape, out.shape
    assert out.dtype == x.dtype
    assert bool(jnp.array_equal(out, ref))

    # 2) Exercise the chunked + tail DMA path with a tiny chunk size:
    #    44 rows -> 5 full 8-row chunks (two in flight) + a 4-row tail DMA.
    x2 = jax.random.normal(k2, (44, 128), dtype=jnp.float32)
    out2 = jax.block_until_ready(
        view(x2, (-1,), copy=True, chunk_bytes=8 * 128 * 4))
    assert bool(jnp.array_equal(out2, x2.reshape(-1)))

    # 3) Recommended fast path: metadata-only, no kernel launch.
    fast = jax.block_until_ready(view(x, (2, -1)))
    assert bool(jnp.array_equal(fast, ref))

    print("KERNEL_OK")
</pallas_src>

<mosaic_0001>
module attributes {stable_mosaic.version = 11 : i64} {
  func.func @kernel(%arg0: memref<2x4x16x16xf32, #tpu.memory_space<any>>, %arg1: memref<2x4x16x16xf32, #tpu.memory_space<any>>, %arg2: memref<2x!tpu.dma_semaphore, #tpu.memory_space<semaphore_mem>>) attributes {dimension_semantics = [], scalar_prefetch = 0 : i64, scratch_operands = 1 : i64, tpu.core_type = #tpu.core_type<tc>} {
    %c0_i32 = arith.constant 0 : i32
    %c0_i32_0 = arith.constant 0 : i32
    %c0_i32_1 = arith.constant 0 : i32
    %c0_i32_2 = arith.constant 0 : i32
    %c0_i32_3 = arith.constant 0 : i32
    %0 = tpu.memref_slice %arg0[%c0_i32_0, %c0_i32_1, %c0_i32_2, %c0_i32_3] : memref<2x4x16x16xf32, #tpu.memory_space<any>> -> memref<2x4x16x16xf32, #tpu.memory_space<any>>
    %c0_i32_4 = arith.constant 0 : i32
    %c0_i32_5 = arith.constant 0 : i32
    %c0_i32_6 = arith.constant 0 : i32
    %c0_i32_7 = arith.constant 0 : i32
    %1 = tpu.memref_slice %arg1[%c0_i32_4, %c0_i32_5, %c0_i32_6, %c0_i32_7] : memref<2x4x16x16xf32, #tpu.memory_space<any>> -> memref<2x4x16x16xf32, #tpu.memory_space<any>>
    %2 = tpu.memref_slice %arg2[%c0_i32] : memref<2x!tpu.dma_semaphore, #tpu.memory_space<semaphore_mem>> -> memref<1x!tpu.dma_semaphore, #tpu.memory_space<semaphore_mem>>
    %3 = tpu.memref_squeeze %2 : memref<1x!tpu.dma_semaphore, #tpu.memory_space<semaphore_mem>> -> memref<!tpu.dma_semaphore, #tpu.memory_space<semaphore_mem>>
    tpu.enqueue_dma source(%0 : memref<2x4x16x16xf32, #tpu.memory_space<any>>) target(%1 : memref<2x4x16x16xf32, #tpu.memory_space<any>>) target_semaphore(%3 : memref<!tpu.dma_semaphore, #tpu.memory_space<semaphore_mem>>)
    %c0_i32_8 = arith.constant 0 : i32
    %c2_i32 = arith.constant 2 : i32
    %c0_i32_9 = arith.constant 0 : i32
    %4 = arith.cmpi eq, %c2_i32, %c0_i32_9 : i32
    %c1_i32 = arith.constant 1 : i32
    %5 = arith.select %4, %c1_i32, %c2_i32 : i32
    %6 = arith.remsi %c0_i32_8, %5 : i32
    %c0_i32_10 = arith.constant 0 : i32
    %7 = arith.cmpi ne, %6, %c0_i32_10 : i32
    %c0_i32_11 = arith.constant 0 : i32
    %8 = arith.cmpi slt, %6, %c0_i32_11 : i32
    %c0_i32_12 = arith.constant 0 : i32
    %9 = arith.cmpi slt, %5, %c0_i32_12 : i32
    %10 = arith.xori %8, %9 : i1
    %11 = arith.andi %10, %7 : i1
    %12 = arith.addi %6, %5 : i32
    %13 = arith.select %11, %12, %6 : i32
    %c2_i32_13 = arith.constant 2 : i32
    %14 = arith.muli %c0_i32_8, %c2_i32_13 : i32
    %c0_i32_14 = arith.constant 0 : i32
    %c0_i32_15 = arith.constant 0 : i32
    %c0_i32_16 = arith.constant 0 : i32
    %15 = tpu.memref_slice %arg0[%14, %c0_i32_14, %c0_i32_15, %c0_i32_16] : memref<2x4x16x16xf32, #tpu.memory_space<any>> -> memref<2x4x16x16xf32, #tpu.memory_space<any>>
    %c0_i32_17 = arith.constant 0 : i32
    %c0_i32_18 = arith.constant 0 : i32
    %c0_i32_19 = arith.constant 0 : i32
    %16 = tpu.memref_slice %arg1[%14, %c0_i32_17, %c0_i32_18, %c0_i32_19] : memref<2x4x16x16xf32, #tpu.memory_space<any>> -> memref<2x4x16x16xf32, #tpu.memory_space<any>>
    %17 = tpu.memref_slice %arg2[%13] : memref<2x!tpu.dma_semaphore, #tpu.memory_space<semaphore_mem>> -> memref<1x!tpu.dma_semaphore, #tpu.memory_space<semaphore_mem>>
    %18 = tpu.memref_squeeze %17 : memref<1x!tpu.dma_semaphore, #tpu.memory_space<semaphore_mem>> -> memref<!tpu.dma_semaphore, #tpu.memory_space<semaphore_mem>>
    tpu.wait_dma2 semaphore(%18 : memref<!tpu.dma_semaphore, #tpu.memory_space<semaphore_mem>>) src(%15 : memref<2x4x16x16xf32, #tpu.memory_space<any>>) dst(%16 : memref<2x4x16x16xf32, #tpu.memory_space<any>>)
    %c2_i32_20 = arith.constant 2 : i32
    %19 = arith.addi %c0_i32_8, %c2_i32_20 : i32
    %c1_i32_21 = arith.constant 1 : i32
    %20 = arith.cmpi slt, %19, %c1_i32_21 : i32
    %21 = arith.extui %20 : i1 to i32
    %c0_i32_22 = arith.constant 0 : i32
    %22 = arith.cmpi ne, %21, %c0_i32_22 : i32
    scf.if %22 {
      %c2_i32_24 = arith.constant 2 : i32
      %23 = arith.addi %c0_i32_8, %c2_i32_24 : i32
      %c2_i32_25 = arith.constant 2 : i32
      %24 = arith.muli %23, %c2_i32_25 : i32
      %c0_i32_26 = arith.constant 0 : i32
      %c0_i32_27 = arith.constant 0 : i32
      %c0_i32_28 = arith.constant 0 : i32
      %25 = tpu.memref_slice %arg0[%24, %c0_i32_26, %c0_i32_27, %c0_i32_28] : memref<2x4x16x16xf32, #tpu.memory_space<any>> -> memref<2x4x16x16xf32, #tpu.memory_space<any>>
      %c0_i32_29 = arith.constant 0 : i32
      %c0_i32_30 = arith.constant 0 : i32
      %c0_i32_31 = arith.constant 0 : i32
      %26 = tpu.memref_slice %arg1[%24, %c0_i32_29, %c0_i32_30, %c0_i32_31] : memref<2x4x16x16xf32, #tpu.memory_space<any>> -> memref<2x4x16x16xf32, #tpu.memory_space<any>>
      %27 = tpu.memref_slice %arg2[%13] : memref<2x!tpu.dma_semaphore, #tpu.memory_space<semaphore_mem>> -> memref<1x!tpu.dma_semaphore, #tpu.memory_space<semaphore_mem>>
      %28 = tpu.memref_squeeze %27 : memref<1x!tpu.dma_semaphore, #tpu.memory_space<semaphore_mem>> -> memref<!tpu.dma_semaphore, #tpu.memory_space<semaphore_mem>>
      tpu.enqueue_dma source(%25 : memref<2x4x16x16xf32, #tpu.memory_space<any>>) target(%26 : memref<2x4x16x16xf32, #tpu.memory_space<any>>) target_semaphore(%28 : memref<!tpu.dma_semaphore, #tpu.memory_space<semaphore_mem>>)
    } else {
    }
    %c1_i32_23 = arith.constant 1 : i32
    return
  }
}

</mosaic_0001>

<bundles_post_ra>
// kernel: tpu_custom_call.1
= control target key start
LH: loop header
LB: loop body
LE: loop exit
PB: predicated region body
PF: predicated region fallthrough
CT: control target
= control target key end

     0   :  { %s44_s6 = smov [#allocation2]   ;;  %s45_s7 = smov [#allocation3]   ;;  %s63_s0 = inlined_call_operand.hbm [shape: f32[2,4,16,16], index: 0, kind: input, shape index: {}]   ;;  %s64_s1 = inlined_call_operand.hbm [shape: f32[2,4,16,16], index: 1, kind: output, shape index: {}]  }
   0x1   :  { %s46_s8 = smov 0  }
   0x2   :  { %18 = dma.general %s63_s0, 2048, %s64_s1, %s44_s6, %s45_s7, [#allocation4], %s46_s8, 0  }
   0x3   :  { %42 = dma.done.wait [#allocation2], 2048 }
   0x4   :  { %43 = vsyncadd [#allocation2], 4294965248 }
   0x5   :  { %24 = vsyncmov [#allocation2] }
   0x8   :  { %s25_s13 = vpop.sfrf %24 }
   0x9   :  { %p37_p0 = scmp.ne.s32.totalorder %s25_s13, 0 }
   0xb   :  { %29 = shalt.err (%p37_p0)  }
   0xc   :  { %31 = vsyncmov [#allocation2 + $0x1] }
   0xf   :  { %s32_s14 = vpop.sfrf %31 }
  0x10   :  { %p38_p1 = scmp.ne.s32.totalorder %s32_s14, 0 }
  0x12   :  { %36 = shalt.err (%p38_p1)  }

</bundles_post_ra>
